<compile_context>
chip_gen: v7x
topology: tpu7x:2x2x1
jax: 0.10.0
libtpu: 0.0.40
codegen_flags: <defaults>
</compile_context>

<pallas_src>
import jax
import jax.numpy as jnp
from jax.experimental import pallas as pl
from jax.experimental.pallas import tpu as pltpu


def _mlp_kernel(p_ref, x_ref, o_ref):
    """p_ref: SMEM f32[13] = [W1 (row-major [2,3]), b1 (3), W2 (3), b2 (1)]
    x_ref: VMEM f32[2, TB]   (feature-major, batch on the lane axis)
    o_ref: VMEM f32[1, TB]
    """
    x0 = x_ref[0:1, :]                       # [1, TB]
    x1 = x_ref[1:2, :]                       # [1, TB]

    # Unrolled hidden layer (3 units) + ReLU + unrolled output contraction.
    # All scalar params come from SMEM and broadcast onto the VPU lanes.
    y = None
    for j in range(3):
        h = jnp.maximum(x0 * p_ref[j] + x1 * p_ref[3 + j] + p_ref[6 + j], 0.0)
        contrib = h * p_ref[9 + j]
        y = contrib if y is None else y + contrib
    o_ref[...] = y + p_ref[12]               # [1, TB]


def simple_model_forward(x, w1, b1, w2, b2, *, tb=None):
    """x: [B, 2] f32 -> [B, 1] f32.  w1: [2,3], b1: [1,3], w2: [3,1], b2: [1,1]."""
    B = x.shape[0]
    if tb is None:
        # Lane-dense tile: at least 128, at most 2048 (fits v7x VMEM budget
        # with double buffering, amortizes per-step overhead for large B).
        tb = min(2048, pl.cdiv(B, 128) * 128)
    b_pad = pl.cdiv(B, tb) * tb

    # Layout plumbing: feature-major [2, B], pad batch to a tile multiple.
    x_t = jnp.transpose(x).astype(jnp.float32)          # [2, B]
    if b_pad != B:
        x_t = jnp.pad(x_t, ((0, 0), (0, b_pad - B)))

    # 13 weight/bias scalars, flattened once, kept resident in SMEM.
    params = jnp.concatenate(
        [w1.reshape(-1), b1.reshape(-1), w2.reshape(-1), b2.reshape(-1)]
    ).astype(jnp.float32)                                # [13]

    out = pl.pallas_call(
        _mlp_kernel,
        out_shape=jax.ShapeDtypeStruct((1, b_pad), jnp.float32),
        grid=(b_pad // tb,),
        in_specs=[
            pl.BlockSpec(memory_space=pltpu.MemorySpace.SMEM),   # params (scalars)
            pl.BlockSpec((2, tb), lambda i: (0, i)),             # x tile [2, TB]
        ],
        out_specs=pl.BlockSpec((1, tb), lambda i: (0, i)),       # y tile [1, TB]
        compiler_params=pltpu.CompilerParams(
            dimension_semantics=("parallel",)),
    )(params, x_t)

    return jnp.transpose(out[:, :B])                     # [B, 1]


def init_params(key):
    """Deterministic init matching nn.Linear shapes (uniform, like PyTorch)."""
    k1, k2, k3, k4 = jax.random.split(key, 4)
    # linear1: weight [3, 2], bias [3]  -> stored transposed as [2, 3]
    bound1 = 1.0 / jnp.sqrt(2.0)
    w1 = jax.random.uniform(k1, (2, 3), jnp.float32, -bound1, bound1)
    b1 = jax.random.uniform(k2, (1, 3), jnp.float32, -bound1, bound1)
    # linear2: weight [1, 3], bias [1]  -> stored transposed as [3, 1]
    bound2 = 1.0 / jnp.sqrt(3.0)
    w2 = jax.random.uniform(k3, (3, 1), jnp.float32, -bound2, bound2)
    b2 = jax.random.uniform(k4, (1, 1), jnp.float32, -bound2, bound2)
    return w1, b1, w2, b2


if __name__ == "__main__":
    key = jax.random.PRNGKey(0)
    k_x, k_p, k_x2 = jax.random.split(key, 3)

    w1, b1, w2, b2 = init_params(k_p)

    # Primary small-shape check (matches the unit test scale).
    B = 8
    x = jax.random.normal(k_x, (B, 2), dtype=jnp.float32)
    out = jax.block_until_ready(simple_model_forward(x, w1, b1, w2, b2))
    ref = jnp.maximum(x @ w1 + b1, 0.0) @ w2 + b2
    assert out.shape == (B, 1)
    assert jnp.allclose(out, ref, atol=1e-5, rtol=1e-5)

    # Second check exercising padding + a multi-step grid.
    B2 = 300
    x2 = jax.random.normal(k_x2, (B2, 2), dtype=jnp.float32)
    out2 = jax.block_until_ready(simple_model_forward(x2, w1, b1, w2, b2))
    ref2 = jnp.maximum(x2 @ w1 + b1, 0.0) @ w2 + b2
    assert out2.shape == (B2, 1)
    assert jnp.allclose(out2, ref2, atol=1e-5, rtol=1e-5)

    print("KERNEL_OK")
</pallas_src>

<mosaic_0001>
module attributes {stable_mosaic.version = 11 : i64} {
  func.func @_mlp_kernel(%arg0: i32, %arg1: memref<13xf32, #tpu.memory_space<smem>>, %arg2: memref<2x128xf32, #tpu.memory_space<vmem>>, %arg3: memref<1x128xf32, #tpu.memory_space<vmem>>) attributes {dimension_semantics = [#tpu.dimension_semantics<parallel>], iteration_bounds = array<i64: 1>, scalar_prefetch = 0 : i64, scratch_operands = 0 : i64, tpu.core_type = #tpu.core_type<tc>, window_params = [{transform_indices = @transform_0, window_bounds = array<i64: 13>}, {transform_indices = @transform_1, window_bounds = array<i64: 2, 128>}, {transform_indices = @transform_2, window_bounds = array<i64: 1, 128>}]} {
    %c0 = arith.constant 0 : index
    %c0_0 = arith.constant 0 : index
    %0 = vector.load %arg2[%c0, %c0_0] : memref<2x128xf32, #tpu.memory_space<vmem>>, vector<1x128xf32>
    %c1 = arith.constant 1 : index
    %c0_1 = arith.constant 0 : index
    %1 = vector.load %arg2[%c1, %c0_1] : memref<2x128xf32, #tpu.memory_space<vmem>>, vector<1x128xf32>
    %c0_2 = arith.constant 0 : index
    %2 = memref.load %arg1[%c0_2] : memref<13xf32, #tpu.memory_space<smem>>
    %3 = vector.broadcast %2 : f32 to vector<1x128xf32>
    %4 = arith.mulf %0, %3 : vector<1x128xf32>
    %c3 = arith.constant 3 : index
    %5 = memref.load %arg1[%c3] : memref<13xf32, #tpu.memory_space<smem>>
    %6 = vector.broadcast %5 : f32 to vector<1x128xf32>
    %7 = arith.mulf %1, %6 : vector<1x128xf32>
    %8 = arith.addf %4, %7 : vector<1x128xf32>
    %c6 = arith.constant 6 : index
    %9 = memref.load %arg1[%c6] : memref<13xf32, #tpu.memory_space<smem>>
    %10 = vector.broadcast %9 : f32 to vector<1x128xf32>
    %11 = arith.addf %8, %10 : vector<1x128xf32>
    %cst = arith.constant 0.000000e+00 : f32
    %12 = vector.broadcast %cst : f32 to vector<1x128xf32>
    %13 = arith.maximumf %11, %12 : vector<1x128xf32>
    %c9 = arith.constant 9 : index
    %14 = memref.load %arg1[%c9] : memref<13xf32, #tpu.memory_space<smem>>
    %15 = vector.broadcast %14 : f32 to vector<1x128xf32>
    %16 = arith.mulf %13, %15 : vector<1x128xf32>
    %c1_3 = arith.constant 1 : index
    %17 = memref.load %arg1[%c1_3] : memref<13xf32, #tpu.memory_space<smem>>
    %18 = vector.broadcast %17 : f32 to vector<1x128xf32>
    %19 = arith.mulf %0, %18 : vector<1x128xf32>
    %c4 = arith.constant 4 : index
    %20 = memref.load %arg1[%c4] : memref<13xf32, #tpu.memory_space<smem>>
    %21 = vector.broadcast %20 : f32 to vector<1x128xf32>
    %22 = arith.mulf %1, %21 : vector<1x128xf32>
    %23 = arith.addf %19, %22 : vector<1x128xf32>
    %c7 = arith.constant 7 : index
    %24 = memref.load %arg1[%c7] : memref<13xf32, #tpu.memory_space<smem>>
    %25 = vector.broadcast %24 : f32 to vector<1x128xf32>
    %26 = arith.addf %23, %25 : vector<1x128xf32>
    %cst_4 = arith.constant 0.000000e+00 : f32
    %27 = vector.broadcast %cst_4 : f32 to vector<1x128xf32>
    %28 = arith.maximumf %26, %27 : vector<1x128xf32>
    %c10 = arith.constant 10 : index
    %29 = memref.load %arg1[%c10] : memref<13xf32, #tpu.memory_space<smem>>
    %30 = vector.broadcast %29 : f32 to vector<1x128xf32>
    %31 = arith.mulf %28, %30 : vector<1x128xf32>
    %32 = arith.addf %16, %31 : vector<1x128xf32>
    %c2 = arith.constant 2 : index
    %33 = memref.load %arg1[%c2] : memref<13xf32, #tpu.memory_space<smem>>
    %34 = vector.broadcast %33 : f32 to vector<1x128xf32>
    %35 = arith.mulf %0, %34 : vector<1x128xf32>
    %c5 = arith.constant 5 : index
    %36 = memref.load %arg1[%c5] : memref<13xf32, #tpu.memory_space<smem>>
    %37 = vector.broadcast %36 : f32 to vector<1x128xf32>
    %38 = arith.mulf %1, %37 : vector<1x128xf32>
    %39 = arith.addf %35, %38 : vector<1x128xf32>
    %c8 = arith.constant 8 : index
    %40 = memref.load %arg1[%c8] : memref<13xf32, #tpu.memory_space<smem>>
    %41 = vector.broadcast %40 : f32 to vector<1x128xf32>
    %42 = arith.addf %39, %41 : vector<1x128xf32>
    %cst_5 = arith.constant 0.000000e+00 : f32
    %43 = vector.broadcast %cst_5 : f32 to vector<1x128xf32>
    %44 = arith.maximumf %42, %43 : vector<1x128xf32>
    %c11 = arith.constant 11 : index
    %45 = memref.load %arg1[%c11] : memref<13xf32, #tpu.memory_space<smem>>
    %46 = vector.broadcast %45 : f32 to vector<1x128xf32>
    %47 = arith.mulf %44, %46 : vector<1x128xf32>
    %48 = arith.addf %32, %47 : vector<1x128xf32>
    %c12 = arith.constant 12 : index
    %49 = memref.load %arg1[%c12] : memref<13xf32, #tpu.memory_space<smem>>
    %50 = vector.broadcast %49 : f32 to vector<1x128xf32>
    %51 = arith.addf %48, %50 : vector<1x128xf32>
    %c0_6 = arith.constant 0 : index
    %c0_7 = arith.constant 0 : index
    %52 = vector.load %arg3[%c0_6, %c0_7] : memref<1x128xf32, #tpu.memory_space<vmem>>, vector<1x128xf32>
    tpu.vector_store %arg3[%c0_6, %c0_7], %51 {strides = array<i32>} : memref<1x128xf32, #tpu.memory_space<vmem>>, vector<1x128xf32>,
    return
  }
  func.func @transform_0(%arg0: i32) -> i32 {
    %c0_i32 = arith.constant 0 : i32
    %c0_i32_0 = arith.constant 0 : i32
    return %c0_i32 : i32
  }
  func.func @transform_1(%arg0: i32) -> (i32, i32) {
    %c0_i32 = arith.constant 0 : i32
    %c0_i32_0 = arith.constant 0 : i32
    return %c0_i32, %arg0 : i32, i32
  }
  func.func @transform_2(%arg0: i32) -> (i32, i32) {
    %c0_i32 = arith.constant 0 : i32
    %c0_i32_0 = arith.constant 0 : i32
    return %c0_i32, %arg0 : i32, i32
  }
}

</mosaic_0001>

<bundles_post_ra>
// kernel: tpu_custom_call.1
= control target key start
LH: loop header
LB: loop body
LE: loop exit
PB: predicated region body
PF: predicated region fallthrough
CT: control target
= control target key end

     0   :  { %7 = vsyncpa [#allocation4], 0  ;;  %s188_s0 = inlined_call_operand.hbm [shape: f32[13], index: 0, kind: input, shape index: {}]   ;;  %s189_s1 = inlined_call_operand.vmem [shape: f32[2,128], index: 1, kind: input, shape index: {}]   ;;  %s190_s2 = inlined_call_operand.hbm [shape: f32[1,128], index: 2, kind: output, shape index: {}]  }
   0x1   :  { %8 = vsyncpa [#allocation3], 0  ;;  %s102_s11 = scalar_lea.hbm %s188_s0, 16 }
   0x2   :  { %p103_p0 = scmp.ne.s32.totalorder %s188_s0, %s102_s11  ;;  %p106_p1 = scmp.lt.u32.totalorder %s102_s11, %s188_s0 }
   0x4   :  { %p108_p2 = pnand %p106_p1, %p103_p0 }
   0x6   :  { %111 = shalt.err (!%p108_p2)
}
   0x7   :  { %s138_s16 = smov [#allocation2]  }
   0x8   :  { %16 = dma.hbm_to_smem %s188_s0, 16, %s138_s16, [#allocation4]  }
   0x9   :  { %134 = dma.done.wait [#allocation4], 16  }
   0xa   :  { %135 = vsyncadd [#allocation4], 4294967280 }
   0xb   :  { %22 = sfence }
   0xc   :  { %s25_s19 = sld [smem:[#allocation2]]  ;;  %s88_s20 = sld [smem:[#allocation2 + $0x3]]  ;;  %v23_v0 = vld [vmem:[%s189_s1] sm:$0x1]  ;;  %v24_v1 = vld [vmem:[%s189_s1 + $0x1] sm:$0x1] }
   0xd   :  { %s89_s21 = sld [smem:[#allocation2 + $0x6]]  ;;  %s91_s22 = sld [smem:[#allocation2 + $0x1]] }
   0xe   :  { %s92_s23 = sld [smem:[#allocation2 + $0x4]]  ;;  %s93_s24 = sld [smem:[#allocation2 + $0x7]] }
   0xf   :  { %s170_s27 = sld [smem:[#allocation2 + $0x9]]  ;;  %s95_s28 = sld [smem:[#allocation2 + $0x2]] }
  0x10   :  { %s96_s0 = sld [smem:[#allocation2 + $0x5]]  ;;  %s97_s3 = sld [smem:[#allocation2 + $0x8]] }
  0x11   :  { %s94_s4 = sld [smem:[#allocation2 + $0xa]]  ;;  %s98_s5 = sld [smem:[#allocation2 + $0xb]] }
  0x12   :  { %v26_v2 = vstv %s25_s19  ;;  %v29_v4 = vstv %s88_s20  ;;  %s99_s1 = sld [smem:[#allocation2 + $0xc]]  ;;  %s139_s6 = smov [#allocation5]  }
  0x13   :  { %v27_v3 = vmul.f32 %v26_v2, %v23_v0  ;;  %v30_v5 = vmul.f32 %v29_v4, %v24_v1  ;;  %v40_v6 = vstv %s91_s22  ;;  %v33_v7 = vstv %s89_s21  ;;  %s79_s7 = sshll.u32 %s139_s6, 4  ;;  %s80_s7 = int_to_ptr.vmem [resolvable:$true] %s79_s7 }
  0x14   :  { %v41_v8 = vmul.f32 %v40_v6, %v23_v0  ;;  %v43_v9 = vstv %s92_s23  ;;  %v47_v13 = vstv %s93_s24  ;;  %s112_s8 = scalar_lea.vmem %s80_s7, 16  ;;  %s116_s9 = scalar_lea.vmem %s80_s7, 32 }
  0x15   :  { %v31_v10 = vadd.f32 %v30_v5, %v27_v3  ;;  %v44_v11 = vmul.f32 %v43_v9, %v24_v1  ;;  %v55_v12 = vstv %s95_s28  ;;  %v37_v19 = vstv %s170_s27  ;;  %p113_p3 = scmp.ne.s32.totalorder %s80_s7, %s112_s8  ;;  %p117_p4 = scmp.lt.s32.totalorder %s80_s7, %s80_s7 }
  0x16   :  { %v56_v14 = vmul.f32 %v55_v12, %v23_v0  ;;  %v58_v15 = vstv %s96_s0  ;;  %v62_v20 = vstv %s97_s3  ;;  %p118_p5 = scmp.lt.s32.totalorder %s116_s9, %s112_s8 }
  0x17   :  { %v34_v16 = vadd.f32 %v33_v7, %v31_v10  ;;  %v45_v17 = vadd.f32 %v44_v11, %v41_v8  ;;  %v59_v18 = vmul.f32 %v58_v15, %v24_v1  ;;  %v51_v24 = vstv %s94_s4 }
  0x18   :  { %v66_v28 = vstv %s98_s5  ;;  %v70_v33 = vstv %s99_s1  ;;  %p119_p6 = por %p118_p5, %p117_p4 }
  0x19   :  { %v35_v21 = vmax.f32 %v34_v16, 0.0  ;;  %v48_v22 = vadd.f32 %v47_v13, %v45_v17  ;;  %v60_v23 = vadd.f32 %v59_v18, %v56_v14 }
  0x1a   :  { %p120_p7 = pnand %p119_p6, %p113_p3 }
  0x1b   :  { %v38_v25 = vmul.f32 %v37_v19, %v35_v21  ;;  %v49_v26 = vmax.f32 %v48_v22, 0.0  ;;  %v63_v27 = vadd.f32 %v62_v20, %v60_v23 }
  0x1d   :  { %v52_v29 = vmul.f32 %v51_v24, %v49_v26  ;;  %v64_v30 = vmax.f32 %v63_v27, 0.0 }
  0x1f   :  { %v53_v31 = vadd.f32 %v52_v29, %v38_v25  ;;  %v67_v32 = vmul.f32 %v66_v28, %v64_v30 }
  0x21   :  { %v68_v34 = vadd.f32 %v67_v32, %v53_v31 }
  0x23   :  { %v71_v35 = vadd.f32 %v70_v33, %v68_v34 }
  0x25   :  { %72 = vst [vmem:[#allocation5] sm:$0x1] %v71_v35 }
  0x26   :  { %123 = shalt.err (!%p120_p7)
}
  0x27   :  { %s124_s12 = scalar_lea.hbm %s190_s2, 16 }
  0x28   :  { %p125_p8 = scmp.ne.s32.totalorder %s190_s2, %s124_s12  ;;  %p128_p9 = scmp.lt.u32.totalorder %s124_s12, %s190_s2 }
  0x2a   :  { %p130_p10 = pnand %p128_p9, %p125_p8 }
  0x2c   :  { %133 = shalt.err (!%p130_p10)
}
  0x2d   :  { %82 = dma.vmem_to_hbm [thread:$0]  %s80_s7, 16, %s190_s2, [#allocation3]  }
  0x2e   :  { %136 = dma.done.wait [#allocation3], 16  }
  0x2f   :  { %137 = vsyncadd [#allocation3], 4294967280 }
  0x30   :  { %86 = vsyncpa [#allocation3], 1 }
  0x31   :  { %87 = vsyncpa [#allocation4], 1 }

</bundles_post_ra>
